<compile_context>
chip_gen: v7x
topology: tpu7x:2x2x1
jax: 0.10.0
libtpu: 0.0.40
codegen_flags: <defaults>
</compile_context>

<pallas_src>
import functools

import jax
import jax.numpy as jnp
from jax.experimental import pallas as pl
from jax.experimental.pallas import tpu as pltpu

LANE = 128


def _round_up(x, m):
    return ((x + m - 1) // m) * m


def _default_num_splits():
    """TensorCores per chip (2 on v7x, else 1); purely a perf knob."""
    try:
        info = pltpu.get_tpu_info()
        for attr in ("num_cores", "core_count", "cores_per_chip", "num_tensorcores"):
            n = getattr(info, attr, None)
            if n is not None:
                n = int(n)
                if 1 <= n <= 8:
                    return min(n, 2)
    except Exception:
        pass
    return 1


def _center_distance_kernel(p_ref, t_ref, out_ref, acc_ref, *, inv_count):
    """p_ref/t_ref: (TR, 128) f32 blocks of interleaved x1,y1,x2,y2 coords.

    out_ref: (8, 128) per-split partial block.  acc_ref: (TR, 128) VMEM scratch.
    """
    k = pl.program_id(1)  # reduction axis (axis 0 is the parallel/megacore split)

    @pl.when(k == 0)
    def _():
        acc_ref[...] = jnp.zeros_like(acc_ref)

    d = p_ref[...] - t_ref[...]                       # (TR, 128) dense diff
    # Each box occupies 4 consecutive lanes [x1, y1, x2, y2] (boxes never
    # straddle a 128-lane row since 4 | 128).  Lane-rotate by -2 (== +126 mod
    # 128) so lane l also sees lane l+2:
    #   s[4b]   = d_x1 + d_x2 = 2*(pred_cx - target_cx)
    #   s[4b+1] = d_y1 + d_y2 = 2*(pred_cy - target_cy)
    s = d + pltpu.roll(d, shift=126, axis=1)
    sq = s * s
    # pair[4b] = s[4b]^2 + s[4b+1]^2 = 4*(dx^2 + dy^2)   (roll by -1 == +127)
    pair = sq + pltpu.roll(sq, shift=127, axis=1)
    lane = jax.lax.broadcasted_iota(jnp.int32, (1, LANE), 1)
    valid = (lane & 3) == 0                           # first lane of each box
    # sqrt(pair[4b]) = 2 * center distance; other lanes are garbage -> select 0.
    acc_ref[...] += jnp.where(valid, jnp.sqrt(pair), 0.0)

    @pl.when(k == pl.num_programs(1) - 1)
    def _():
        total = jnp.sum(acc_ref[...]) * inv_count     # single cross-lane reduce
        out_ref[...] = jnp.full(out_ref.shape, total, out_ref.dtype)


def _distance_loss_xla(pred_boxes, target_boxes):
    """Small-N fast path: plain fused XLA elementwise + reduce."""
    p = pred_boxes.astype(jnp.float32)
    t = target_boxes.astype(jnp.float32)
    dx = (p[..., 0] + p[..., 2]) - (t[..., 0] + t[..., 2])
    dy = (p[..., 1] + p[..., 3]) - (t[..., 1] + t[..., 3])
    dist = 0.5 * jnp.sqrt(dx * dx + dy * dy)          # (B, M)
    return dist.mean(axis=1).mean()


def custom_distance_loss(pred_boxes, target_boxes, *, tr_max=4096, num_splits=None,
                         min_boxes_for_pallas=65536):
    """pred_boxes, target_boxes: (B, M, 4) float arrays.  Returns scalar loss."""
    B, M, _ = pred_boxes.shape
    if B == 0 or M == 0:  # matches torch returning 0 for an empty batch / no boxes
        return jnp.float32(0.0)

    N = B * M
    if N < min_boxes_for_pallas:
        # Launch + relayout overhead would dominate; XLA's fused kernel wins here.
        return _distance_loss_xla(pred_boxes, target_boxes)

    if num_splits is None:
        num_splits = _default_num_splits()
    num_splits = max(1, int(num_splits))

    # Natural flattened layout: (B, M, 4) -> (4N,) -> (R, 128); free reshape,
    # coordinates stay interleaved along lanes and are de-interleaved in-kernel.
    n_elems = 4 * N
    R = pl.cdiv(n_elems, LANE)
    tr = min(int(tr_max), _round_up(R, 8))
    tr = max(8, (tr // 8) * 8)                        # sublane-aligned block rows
    steps = pl.cdiv(R, tr * num_splits)
    r_pad = steps * num_splits * tr
    total_elems = r_pad * LANE

    flat_p = pred_boxes.reshape(-1).astype(jnp.float32)
    flat_t = target_boxes.reshape(-1).astype(jnp.float32)
    pad = total_elems - n_elems
    if pad:
        # Zero-padded boxes contribute sqrt(0)=0; skipped entirely when the
        # caller's 4*B*M already divides the chunk size (no extra HBM pass).
        flat_p = jnp.pad(flat_p, (0, pad))
        flat_t = jnp.pad(flat_t, (0, pad))
    p2d = flat_p.reshape(r_pad, LANE)
    t2d = flat_t.reshape(r_pad, LANE)

    # sqrt(pair) = 2 * distance, so fold the 0.5 into the final scale.
    kernel = functools.partial(_center_distance_kernel, inv_count=0.5 / float(N))

    partials = pl.pallas_call(
        kernel,
        out_shape=jax.ShapeDtypeStruct((num_splits * 8, LANE), jnp.float32),
        grid_spec=pltpu.PrefetchScalarGridSpec(
            num_scalar_prefetch=0,
            grid=(num_splits, steps),
            in_specs=[
                pl.BlockSpec((tr, LANE), lambda j, k: (j * steps + k, 0)),
                pl.BlockSpec((tr, LANE), lambda j, k: (j * steps + k, 0)),
            ],
            out_specs=pl.BlockSpec((8, LANE), lambda j, k: (j, 0)),
            scratch_shapes=[pltpu.VMEM((tr, LANE), jnp.float32)],
        ),
        compiler_params=pltpu.CompilerParams(
            dimension_semantics=("parallel", "arbitrary"),
            vmem_limit_bytes=32 * 1024 * 1024,
        ),
        cost_estimate=pl.CostEstimate(
            flops=8 * r_pad * LANE,
            transcendentals=r_pad * LANE,
            bytes_accessed=2 * r_pad * LANE * 4 + num_splits * 8 * LANE * 4,
        ),
    )(p2d, t2d)

    # Each split's (8,128) block is filled with its (already scaled) partial sum.
    return jnp.sum(partials.reshape(num_splits, 8, LANE)[:, 0, 0])


def custom_distance_loss_ref(pred_boxes, target_boxes):
    """Pure-JAX reference mirroring the PyTorch semantics (per-image mean, batch average)."""
    pcx = (pred_boxes[..., 0] + pred_boxes[..., 2]) / 2
    pcy = (pred_boxes[..., 1] + pred_boxes[..., 3]) / 2
    tcx = (target_boxes[..., 0] + target_boxes[..., 2]) / 2
    tcy = (target_boxes[..., 1] + target_boxes[..., 3]) / 2
    dist = jnp.sqrt((pcx - tcx) ** 2 + (pcy - tcy) ** 2)  # (B, M)
    return dist.mean(axis=1).mean()


if __name__ == "__main__":
    key = jax.random.PRNGKey(0)
    k1, k2, k3, k4 = jax.random.split(key, 4)

    # Small shapes consistent with the module: batch of 4 images, max_objects=7 boxes, 4 coords.
    B, M = 4, 7
    pred_boxes = jax.random.uniform(k1, (B, M, 4), dtype=jnp.float32) * 100.0
    target_boxes = jax.random.uniform(k2, (B, M, 4), dtype=jnp.float32) * 100.0
    ref = custom_distance_loss_ref(pred_boxes, target_boxes)

    # Force the Pallas path (the default would take the small-N XLA fast path).
    out = custom_distance_loss(pred_boxes, target_boxes, min_boxes_for_pallas=0)
    out = jax.block_until_ready(out)
    assert jnp.allclose(out, ref, rtol=1e-4, atol=1e-4), (out, ref)

    # Exercise multi-step accumulation and the 2-way core split with tiny tiles.
    B2, M2 = 8, 300
    p2 = jax.random.uniform(k3, (B2, M2, 4), dtype=jnp.float32) * 100.0
    t2 = jax.random.uniform(k4, (B2, M2, 4), dtype=jnp.float32) * 100.0
    out2 = jax.block_until_ready(
        custom_distance_loss(p2, t2, min_boxes_for_pallas=0, tr_max=8, num_splits=2))
    ref2 = custom_distance_loss_ref(p2, t2)
    assert jnp.allclose(out2, ref2, rtol=1e-4, atol=1e-4), (out2, ref2)

    # Default path (small N -> pure-XLA fast path) must agree as well.
    out3 = jax.block_until_ready(custom_distance_loss(pred_boxes, target_boxes))
    assert jnp.allclose(out3, ref, rtol=1e-4, atol=1e-4), (out3, ref)

    print("KERNEL_OK")
</pallas_src>

<mosaic_0001>
module attributes {stable_mosaic.version = 11 : i64} {
  func.func @_center_distance_kernel(%arg0: i32, %arg1: i32, %arg2: memref<8x128xf32, #tpu.memory_space<vmem>>, %arg3: memref<8x128xf32, #tpu.memory_space<vmem>>, %arg4: memref<8x128xf32, #tpu.memory_space<vmem>>, %arg5: memref<8x128xf32, #tpu.memory_space<vmem>>) attributes {dimension_semantics = [#tpu.dimension_semantics<parallel>, #tpu.dimension_semantics<arbitrary>], iteration_bounds = array<i64: 1, 1>, scalar_prefetch = 0 : i64, scratch_operands = 1 : i64, tpu.core_type = #tpu.core_type<tc>, window_params = [{transform_indices = @transform_0, window_bounds = array<i64: 8, 128>}, {transform_indices = @transform_1, window_bounds = array<i64: 8, 128>}, {transform_indices = @transform_2, window_bounds = array<i64: 8, 128>}]} {
    %c0_i32 = arith.constant 0 : i32
    %0 = arith.cmpi eq, %arg1, %c0_i32 : i32
    %1 = arith.extui %0 : i1 to i32
    %c0_i32_0 = arith.constant 0 : i32
    %2 = arith.cmpi ne, %1, %c0_i32_0 : i32
    scf.if %2 {
      %cst_11 = arith.constant 0.000000e+00 : f32
      %27 = vector.broadcast %cst_11 : f32 to vector<8x128xf32>
      %c0_12 = arith.constant 0 : index
      %c0_13 = arith.constant 0 : index
      %28 = vector.load %arg5[%c0_12, %c0_13] : memref<8x128xf32, #tpu.memory_space<vmem>>, vector<8x128xf32>
      tpu.vector_store %arg5[%c0_12, %c0_13], %27 {strides = array<i32>} : memref<8x128xf32, #tpu.memory_space<vmem>>, vector<8x128xf32>,
    } else {
    }
    %c0 = arith.constant 0 : index
    %c0_1 = arith.constant 0 : index
    %3 = vector.load %arg2[%c0, %c0_1] : memref<8x128xf32, #tpu.memory_space<vmem>>, vector<8x128xf32>
    %c0_2 = arith.constant 0 : index
    %c0_3 = arith.constant 0 : index
    %4 = vector.load %arg3[%c0_2, %c0_3] : memref<8x128xf32, #tpu.memory_space<vmem>>, vector<8x128xf32>
    %5 = arith.subf %3, %4 : vector<8x128xf32>
    %c126_i32 = arith.constant 126 : i32
    %6 = tpu.dynamic_rotate %5 by %c126_i32 dim 1 : vector<8x128xf32>, i32 -> vector<8x128xf32>
    %7 = arith.addf %5, %6 : vector<8x128xf32>
    %8 = arith.mulf %7, %7 : vector<8x128xf32>
    %c127_i32 = arith.constant 127 : i32
    %9 = tpu.dynamic_rotate %8 by %c127_i32 dim 1 : vector<8x128xf32>, i32 -> vector<8x128xf32>
    %10 = arith.addf %8, %9 : vector<8x128xf32>
    %11 = tpu.iota {dimensions = array<i32: 1>} : vector<1x128xi32>
    %c3_i32 = arith.constant 3 : i32
    %12 = vector.broadcast %c3_i32 : i32 to vector<1x128xi32>
    %13 = arith.andi %11, %12 : vector<1x128xi32>
    %c0_i32_4 = arith.constant 0 : i32
    %14 = vector.broadcast %c0_i32_4 : i32 to vector<1x128xi32>
    %15 = arith.cmpi eq, %13, %14 : vector<1x128xi32>
    %c0_5 = arith.constant 0 : index
    %c0_6 = arith.constant 0 : index
    %16 = vector.load %arg5[%c0_5, %c0_6] : memref<8x128xf32, #tpu.memory_space<vmem>>, vector<8x128xf32>
    %17 = math.sqrt %10 : vector<8x128xf32>
    %cst = arith.constant 0.000000e+00 : f32
    %18 = vector.shape_cast %15 : vector<1x128xi1> to vector<1x128xi1>
    %19 = vector.broadcast %18 : vector<1x128xi1> to vector<8x128xi1>
    %20 = vector.broadcast %cst : f32 to vector<8x128xf32>
    %21 = arith.select %19, %17, %20 : vector<8x128xi1>, vector<8x128xf32>
    %22 = arith.addf %16, %21 : vector<8x128xf32>
    %c0_7 = arith.constant 0 : index
    %c0_8 = arith.constant 0 : index
    %23 = vector.load %arg5[%c0_7, %c0_8] : memref<8x128xf32, #tpu.memory_space<vmem>>, vector<8x128xf32>
    tpu.vector_store %arg5[%c0_7, %c0_8], %22 {strides = array<i32>} : memref<8x128xf32, #tpu.memory_space<vmem>>, vector<8x128xf32>,
    %c0_i32_9 = arith.constant 0 : i32
    %24 = arith.cmpi eq, %arg1, %c0_i32_9 : i32
    %25 = arith.extui %24 : i1 to i32
    %c0_i32_10 = arith.constant 0 : i32
    %26 = arith.cmpi ne, %25, %c0_i32_10 : i32
    scf.if %26 {
      %c0_11 = arith.constant 0 : index
      %c0_12 = arith.constant 0 : index
      %27 = vector.load %arg5[%c0_11, %c0_12] : memref<8x128xf32, #tpu.memory_space<vmem>>, vector<8x128xf32>
      %28 = vector.shape_cast %27 : vector<8x128xf32> to vector<1x8x128xf32>
      %cst_13 = arith.constant dense<0.000000e+00> : vector<1xf32>
      %29 = vector.multi_reduction <add>, %28, %cst_13 [1, 2] : vector<1x8x128xf32> to vector<1xf32>
      %30 = vector.shape_cast %29 : vector<1xf32> to vector<1x1x1xf32>
      %31 = vector.extract %30[0, 0, 0] : f32 from vector<1x1x1xf32>
      %cst_14 = arith.constant 0.0178571437 : f32
      %32 = arith.mulf %31, %cst_14 : f32
      %33 = vector.broadcast %32 : f32 to vector<8x128xf32>
      %c0_15 = arith.constant 0 : index
      %c0_16 = arith.constant 0 : index
      %34 = vector.load %arg4[%c0_15, %c0_16] : memref<8x128xf32, #tpu.memory_space<vmem>>, vector<8x128xf32>
      tpu.vector_store %arg4[%c0_15, %c0_16], %33 {strides = array<i32>} : memref<8x128xf32, #tpu.memory_space<vmem>>, vector<8x128xf32>,
    } else {
    }
    return
  }
  func.func @transform_0(%arg0: i32, %arg1: i32) -> (i32, i32) {
    %c1_i32 = arith.constant 1 : i32
    %0 = arith.muli %arg0, %c1_i32 : i32
    %1 = arith.addi %0, %arg1 : i32
    %c0_i32 = arith.constant 0 : i32
    %c0_i32_0 = arith.constant 0 : i32
    return %1, %c0_i32 : i32, i32
  }
  func.func @transform_1(%arg0: i32, %arg1: i32) -> (i32, i32) {
    %c1_i32 = arith.constant 1 : i32
    %0 = arith.muli %arg0, %c1_i32 : i32
    %1 = arith.addi %0, %arg1 : i32
    %c0_i32 = arith.constant 0 : i32
    %c0_i32_0 = arith.constant 0 : i32
    return %1, %c0_i32 : i32, i32
  }
  func.func @transform_2(%arg0: i32, %arg1: i32) -> (i32, i32) {
    %c0_i32 = arith.constant 0 : i32
    %c0_i32_0 = arith.constant 0 : i32
    return %arg0, %c0_i32 : i32, i32
  }
}

</mosaic_0001>

<bundles_post_ra>
// kernel: tpu_custom_call.1
= control target key start
LH: loop header
LB: loop body
LE: loop exit
PB: predicated region body
PF: predicated region fallthrough
CT: control target
= control target key end

     0   :  { %7 = vsyncpa [#allocation4], 0  ;;  %s245_s0 = inlined_call_operand.hbm [shape: f32[8,128], index: 0, kind: input, shape index: {}]   ;;  %s246_s1 = inlined_call_operand.hbm [shape: f32[8,128], index: 1, kind: input, shape index: {}]   ;;  %s247_s2 = inlined_call_operand.hbm [shape: f32[8,128], index: 2, kind: output, shape index: {}]  }
   0x1   :  { %8 = vsyncpa [#allocation7], 0 }
   0x2   :  { %9 = vsyncpa [#allocation5], 0  ;;  %s189_s9 = smov [#allocation3]   ;;  %s190_s11 = smov [#allocation6]  }
   0x3   :  { %s19_s10 = sshll.u32 %s189_s9, 4  ;;  %s32_s12 = sshll.u32 %s190_s11, 4  ;;  %s20_s10 = int_to_ptr.vmem [resolvable:$true] %s19_s10  ;;  %s33_s12 = int_to_ptr.vmem [resolvable:$true] %s32_s12 }
   0x4   :  { %s117_s15 = scalar_lea.hbm %s245_s0, 128 }
   0x5   :  { %p118_p0 = scmp.ne.s32.totalorder %s245_s0, %s117_s15  ;;  %p121_p1 = scmp.lt.u32.totalorder %s117_s15, %s245_s0 }
   0x7   :  { %p123_p2 = pnand %p121_p1, %p118_p0 }
   0x9   :  { %126 = shalt.err (!%p123_p2)
}
   0xa   :  { %s127_s20 = scalar_lea.vmem %s20_s10, 128  ;;  %p132_p4 = scmp.lt.s32.totalorder %s20_s10, %s20_s10 }
   0xb   :  { %p128_p3 = scmp.ne.s32.totalorder %s20_s10, %s127_s20  ;;  %p133_p5 = scmp.lt.s32.totalorder %s127_s20, %s127_s20 }
   0xd   :  { %p134_p6 = por %p133_p5, %p132_p4 }
   0xf   :  { %p135_p7 = pnand %p134_p6, %p128_p3 }
  0x11   :  { %138 = shalt.err (!%p135_p7)
}
  0x12   :  { %22 = dma.hbm_to_vmem [thread:$0]  %s245_s0, 128, %s20_s10, [#allocation4]  }
  0x13   :  { %s139_s25 = scalar_lea.hbm %s246_s1, 128 }
  0x14   :  { %p140_p8 = scmp.ne.s32.totalorder %s246_s1, %s139_s25  ;;  %p143_p9 = scmp.lt.u32.totalorder %s139_s25, %s246_s1 }
  0x16   :  { %p145_p10 = pnand %p143_p9, %p140_p8 }
  0x18   :  { %148 = shalt.err (!%p145_p10)
}
  0x19   :  { %s149_s30 = scalar_lea.vmem %s33_s12, 128  ;;  %p154_p12 = scmp.lt.s32.totalorder %s33_s12, %s33_s12 }
  0x1a   :  { %p150_p11 = scmp.ne.s32.totalorder %s33_s12, %s149_s30  ;;  %p155_p13 = scmp.lt.s32.totalorder %s149_s30, %s149_s30 }
  0x1c   :  { %p156_p0 = por %p155_p13, %p154_p12 }
  0x1e   :  { %p157_p1 = pnand %p156_p0, %p150_p11 }
  0x20   :  { %160 = shalt.err (!%p157_p1)
}
  0x21   :  { %35 = dma.hbm_to_vmem [thread:$0]  %s246_s1, 128, %s33_s12, [#allocation7]  }
  0x22   :  { %183 = dma.done.wait [#allocation4], 128  }
  0x23   :  { %184 = vsyncadd [#allocation4], 4294967168 }
  0x24   :  { %185 = dma.done.wait [#allocation7], 128  }
  0x25   :  { %186 = vsyncadd [#allocation7], 4294967168  ;;  %v49_v0 = vld [vmem:[#allocation3] sm:$0xff]  ;;  %v50_v1 = vld [vmem:[#allocation6] sm:$0xff]  ;;  %s191_s4 = smov 126   ;;  %s192_s5 = smov 127   ;;  %v59_v8 = vlaneseq }
  0x26   :  { %v51_v2 = vsub.f32 %v49_v0, %v50_v1  ;;  %s193_s1 = smov [#allocation8]  }
  0x27   :  { %v60_v9 = vand.u32 127, %v59_v8  ;;  %s98_s6 = sshll.u32 %s193_s1, 4  ;;  %s99_s6 = int_to_ptr.vmem [resolvable:$true] %s98_s6 }
  0x28   :  { %52 = vrot.lane.b32.xlu0 %v51_v2, %s191_s4  ;;  %s161_s9 = scalar_lea.vmem %s99_s6, 128  ;;  %p166_p3 = scmp.lt.s32.totalorder %s99_s6, %s99_s6 }
  0x29   :  { %v61_v10 = vand.u32 3, %v60_v9  ;;  %p162_p2 = scmp.ne.s32.totalorder %s99_s6, %s161_s9  ;;  %p167_p4 = scmp.lt.s32.totalorder %s161_s9, %s161_s9 }
  0x2b   :  { %vm62_vm0 = vcmp.eq.s32.totalorder %v61_v10, 0  ;;  %p168_p5 = por %p167_p4, %p166_p3 }
  0x2d   :  { %p169_p6 = pnand %p168_p5, %p162_p2 }
  0x9a   :  { %v53_v3 = vpop.permute.xlu0 %52 }
  0x9b   :  { %v54_v4 = vadd.f32 %v53_v3, %v51_v2 }
  0x9d   :  { %v55_v5 = vmul.f32 %v54_v4, %v54_v4 }
  0x9f   :  { %56 = vrot.lane.b32.xlu0 %v55_v5, %s192_s5 }
 0x111   :  { %v57_v6 = vpop.permute.xlu0 %56 }
 0x112   :  { %v58_v7 = vadd.f32 %v57_v6, %v55_v5 }
 0x114   :  { %115 = vrsqrt.f32 %v58_v7  ;;  %vm66_vm1 = vcmp.eq.f32.partialorder %v58_v7, inf  ;;  %v69_v13 = vand.u32 2147483648, %v58_v7  ;;  %vm68_vm2 = vcmp.eq.f32.partialorder %v58_v7, 0.0 }
 0x11e   :  { %v116_v11 = vpop.eup %115 }
 0x11f   :  { %v65_v12 = vmul.f32 %v116_v11, %v58_v7 }
 0x121   :  { %v67_v14 = vsel %vm66_vm1, %v58_v7, %v65_v12 }
 0x122   :  { %v70_v15 = vsel %vm68_vm2, %v69_v13, %v67_v14 }
 0x123   :  { %v73_v16 = vsel %vm62_vm0, %v70_v15, 0.0 }
 0x124   :  { %80 = vadd.xlane.f32.xlu1 %v73_v16 }
 0x1b1   :  { %v81_v17 = vpop.xlane.xlu1 %80 }
 0x1b2   :  { %v82_v18 = vrot.slane %v81_v17, 4 }
 0x1b4   :  { %v83_v19 = vadd.f32 %v82_v18, %v81_v17 }
 0x1b6   :  { %v84_v20 = vrot.slane %v83_v19, 2 }
 0x1b8   :  { %v85_v21 = vadd.f32 %v84_v20, %v83_v19 }
 0x1ba   :  { %v86_v22 = vrot.slane %v85_v21, 1 }
 0x1bc   :  { %v87_v23 = vadd.f32 %v86_v22, %v85_v21 }
 0x1be   :  { %108 = vpush %v87_v23 }
 0x1ef   :  { %s109_s7 = spop %108 }
 0x1f0   :  { %s89_s8 = smul.f32 0.017857144, %s109_s7 }
 0x1f2   :  { %v90_v24 = vstv %s89_s8 }
 0x1f3   :  { %91 = vst [vmem:[#allocation8] sm:$0xff] %v90_v24 }
 0x1f4   :  { %172 = shalt.err (!%p169_p6)
}
 0x1f5   :  { %s173_s12 = scalar_lea.hbm %s247_s2, 128 }
 0x1f6   :  { %p174_p7 = scmp.ne.s32.totalorder %s247_s2, %s173_s12  ;;  %p177_p8 = scmp.lt.u32.totalorder %s173_s12, %s247_s2 }
 0x1f8   :  { %p179_p9 = pnand %p177_p8, %p174_p7 }
 0x1fa   :  { %182 = shalt.err (!%p179_p9)
}
 0x1fb   :  { %101 = dma.vmem_to_hbm [thread:$0]  %s99_s6, 128, %s247_s2, [#allocation5]  }
 0x1fc   :  { %187 = dma.done.wait [#allocation5], 128  }
 0x1fd   :  { %188 = vsyncadd [#allocation5], 4294967168 }
 0x1fe   :  { %105 = vsyncpa [#allocation4], 1 }
 0x1ff   :  { %106 = vsyncpa [#allocation7], 1 }
 0x200   :  { %107 = vsyncpa [#allocation5], 1 }

</bundles_post_ra>
